<compile_context>
chip_gen: v5e
topology: v5e:2x2
jax: 0.10.0
libtpu: 0.0.40
codegen_flags: <defaults>
</compile_context>

<pallas_src>
import jax
import jax.numpy as jnp
from jax.experimental import pallas as pl
from jax.experimental.pallas import tpu as pltpu


def _round_up(x, m):
    return ((x + m - 1) // m) * m


def _residual_linear_kernel(x_lhs_ref, w_ref, b_ref, x_res_ref, o_ref, acc_ref):
    """out = (x @ W + b) + x  with a K-tiled f32 accumulator."""
    k = pl.program_id(2)

    @pl.when(k == 0)
    def _():
        acc_ref[...] = jnp.zeros_like(acc_ref)

    # bf16 operands feed the MXU at full rate on v6e/v7x; accumulate in f32.
    acc_ref[...] += jnp.dot(
        x_lhs_ref[...].astype(jnp.bfloat16),
        w_ref[...].astype(jnp.bfloat16),
        preferred_element_type=jnp.float32,
    )

    @pl.when(k == pl.num_programs(2) - 1)
    def _():
        y = acc_ref[...] + b_ref[...].astype(jnp.float32)          # bias (f32, VPU)
        y = y + x_res_ref[...].astype(jnp.float32)                 # residual (f32)
        o_ref[...] = y.astype(o_ref.dtype)


def residual_linear(x, w, b, *, tm=512, tn=512):
    """Residual(Linear)(x) == x @ w + b + x.

    x: (B, S, H) float32
    w: (H, H)    float32, stored as (in_features, out_features)
    b: (H,)      float32
    """
    B, S, H = x.shape
    M = B * S
    x2d = x.reshape(M, H)

    # Tile sizes: rows on sublanes (multiple of 8), hidden on lanes (x128).
    M_tile = min(tm, _round_up(M, 8))
    H_tile = min(tn, _round_up(H, 128))
    M_pad = _round_up(M, M_tile)
    H_pad = _round_up(H, H_tile)

    if M_pad != M or H_pad != H:
        x_p = jnp.pad(x2d, ((0, M_pad - M), (0, H_pad - H)))
        w_p = jnp.pad(w, ((0, H_pad - H), (0, H_pad - H)))
        b_p = jnp.pad(b, (0, H_pad - H))
    else:
        x_p, w_p, b_p = x2d, w, b
    b2d = b_p.reshape(1, H_pad)

    grid = (M_pad // M_tile, H_pad // H_tile, H_pad // H_tile)  # (rows, cols, K)

    out = pl.pallas_call(
        _residual_linear_kernel,
        out_shape=jax.ShapeDtypeStruct((M_pad, H_pad), x.dtype),
        grid=grid,
        in_specs=[
            pl.BlockSpec((M_tile, H_tile), lambda i, j, k: (i, k)),  # x (matmul LHS)
            pl.BlockSpec((H_tile, H_tile), lambda i, j, k: (k, j)),  # W
            pl.BlockSpec((1, H_tile), lambda i, j, k: (0, j)),       # bias (resident)
            pl.BlockSpec((M_tile, H_tile), lambda i, j, k: (i, j)),  # x (residual)
        ],
        out_specs=pl.BlockSpec((M_tile, H_tile), lambda i, j, k: (i, j)),
        scratch_shapes=[pltpu.VMEM((M_tile, H_tile), jnp.float32)],
        compiler_params=pltpu.CompilerParams(
            dimension_semantics=("parallel", "parallel", "arbitrary"),
            vmem_limit_bytes=32 * 1024 * 1024,
        ),
    )(x_p, w_p, b2d, x_p)

    return out[:M, :H].reshape(B, S, H)


if __name__ == "__main__":
    key = jax.random.PRNGKey(0)
    kx, kw, kb = jax.random.split(key, 3)

    # Small, lane-dense demo shapes: batch=2, seq=8, hidden=128.
    B, S, H = 2, 8, 128
    x = jax.random.normal(kx, (B, S, H), dtype=jnp.float32)
    # Deterministic "fn" parameters (nn.Linear(H, H) equivalent), stored as
    # (in_features, out_features) so the kernel does x @ w directly.
    w = jax.random.normal(kw, (H, H), dtype=jnp.float32) * 0.02
    b = jax.random.normal(kb, (H,), dtype=jnp.float32) * 0.02

    out = residual_linear(x, w, b)
    jax.block_until_ready(out)

    # Reference with identical numerics (bf16 MXU operands, f32 accumulation),
    # confirming Residual semantics: fn(x) + x.
    x2d = x.reshape(B * S, H)
    y_ref = jnp.dot(
        x2d.astype(jnp.bfloat16), w.astype(jnp.bfloat16),
        preferred_element_type=jnp.float32,
    )
    ref = (y_ref + b + x2d).reshape(B, S, H)
    assert jnp.allclose(out, ref, atol=1e-3, rtol=1e-3), "mismatch vs reference"

    print("KERNEL_OK")
</pallas_src>

<mosaic_0001>
module attributes {stable_mosaic.version = 11 : i64} {
  func.func @_residual_linear_kernel(%arg0: i32, %arg1: i32, %arg2: i32, %arg3: memref<16x128xf32, #tpu.memory_space<vmem>>, %arg4: memref<128x128xf32, #tpu.memory_space<vmem>>, %arg5: memref<1x128xf32, #tpu.memory_space<vmem>>, %arg6: memref<16x128xf32, #tpu.memory_space<vmem>>, %arg7: memref<16x128xf32, #tpu.memory_space<vmem>>, %arg8: memref<16x128xf32, #tpu.memory_space<vmem>>) attributes {dimension_semantics = [#tpu.dimension_semantics<parallel>, #tpu.dimension_semantics<parallel>, #tpu.dimension_semantics<arbitrary>], iteration_bounds = array<i64: 1, 1, 1>, scalar_prefetch = 0 : i64, scratch_operands = 1 : i64, tpu.core_type = #tpu.core_type<tc>, window_params = [{transform_indices = @transform_0, window_bounds = array<i64: 16, 128>}, {transform_indices = @transform_1, window_bounds = array<i64: 128, 128>}, {transform_indices = @transform_2, window_bounds = array<i64: 1, 128>}, {transform_indices = @transform_3, window_bounds = array<i64: 16, 128>}, {transform_indices = @transform_4, window_bounds = array<i64: 16, 128>}]} {
    %c0_i32 = arith.constant 0 : i32
    %0 = arith.cmpi eq, %arg2, %c0_i32 : i32
    %1 = arith.extui %0 : i1 to i32
    %c0_i32_0 = arith.constant 0 : i32
    %2 = arith.cmpi ne, %1, %c0_i32_0 : i32
    scf.if %2 {
      %cst_10 = arith.constant 0.000000e+00 : f32
      %14 = vector.broadcast %cst_10 : f32 to vector<16x128xf32>
      %c0_11 = arith.constant 0 : index
      %c0_12 = arith.constant 0 : index
      %15 = vector.load %arg8[%c0_11, %c0_12] : memref<16x128xf32, #tpu.memory_space<vmem>>, vector<16x128xf32>
      tpu.vector_store %arg8[%c0_11, %c0_12], %14 {strides = array<i32>} : memref<16x128xf32, #tpu.memory_space<vmem>>, vector<16x128xf32>,
    } else {
    }
    %c0 = arith.constant 0 : index
    %c0_1 = arith.constant 0 : index
    %3 = vector.load %arg8[%c0, %c0_1] : memref<16x128xf32, #tpu.memory_space<vmem>>, vector<16x128xf32>
    %c0_2 = arith.constant 0 : index
    %c0_3 = arith.constant 0 : index
    %4 = vector.load %arg3[%c0_2, %c0_3] : memref<16x128xf32, #tpu.memory_space<vmem>>, vector<16x128xf32>
    %5 = arith.truncf %4 : vector<16x128xf32> to vector<16x128xbf16>
    %c0_4 = arith.constant 0 : index
    %c0_5 = arith.constant 0 : index
    %6 = vector.load %arg4[%c0_4, %c0_5] : memref<128x128xf32, #tpu.memory_space<vmem>>, vector<128x128xf32>
    %7 = arith.truncf %6 : vector<128x128xf32> to vector<128x128xbf16>
    %cst = arith.constant dense<0.000000e+00> : vector<16x128xf32>
    %8 = tpu.matmul %5, %7, %cst {dimension_numbers = #tpu.dot_dimension_numbers<[1], [0], [0], [1], [0, 0, 1, 1], [], []>} : vector<16x128xbf16>, vector<128x128xbf16>, vector<16x128xf32> -> vector<16x128xf32>
    %9 = arith.addf %3, %8 : vector<16x128xf32>
    %c0_6 = arith.constant 0 : index
    %c0_7 = arith.constant 0 : index
    %10 = vector.load %arg8[%c0_6, %c0_7] : memref<16x128xf32, #tpu.memory_space<vmem>>, vector<16x128xf32>
    tpu.vector_store %arg8[%c0_6, %c0_7], %9 {strides = array<i32>} : memref<16x128xf32, #tpu.memory_space<vmem>>, vector<16x128xf32>,
    %c0_i32_8 = arith.constant 0 : i32
    %11 = arith.cmpi eq, %arg2, %c0_i32_8 : i32
    %12 = arith.extui %11 : i1 to i32
    %c0_i32_9 = arith.constant 0 : i32
    %13 = arith.cmpi ne, %12, %c0_i32_9 : i32
    scf.if %13 {
      %c0_10 = arith.constant 0 : index
      %c0_11 = arith.constant 0 : index
      %14 = vector.load %arg8[%c0_10, %c0_11] : memref<16x128xf32, #tpu.memory_space<vmem>>, vector<16x128xf32>
      %c0_12 = arith.constant 0 : index
      %c0_13 = arith.constant 0 : index
      %15 = vector.load %arg5[%c0_12, %c0_13] : memref<1x128xf32, #tpu.memory_space<vmem>>, vector<1x128xf32>
      %16 = vector.broadcast %15 : vector<1x128xf32> to vector<16x128xf32>
      %17 = arith.addf %14, %16 : vector<16x128xf32>
      %c0_14 = arith.constant 0 : index
      %c0_15 = arith.constant 0 : index
      %18 = vector.load %arg6[%c0_14, %c0_15] : memref<16x128xf32, #tpu.memory_space<vmem>>, vector<16x128xf32>
      %19 = arith.addf %17, %18 : vector<16x128xf32>
      %c0_16 = arith.constant 0 : index
      %c0_17 = arith.constant 0 : index
      %20 = vector.load %arg7[%c0_16, %c0_17] : memref<16x128xf32, #tpu.memory_space<vmem>>, vector<16x128xf32>
      tpu.vector_store %arg7[%c0_16, %c0_17], %19 {strides = array<i32>} : memref<16x128xf32, #tpu.memory_space<vmem>>, vector<16x128xf32>,
    } else {
    }
    return
  }
  func.func @transform_0(%arg0: i32, %arg1: i32, %arg2: i32) -> (i32, i32) {
    %c0_i32 = arith.constant 0 : i32
    return %arg0, %arg2 : i32, i32
  }
  func.func @transform_1(%arg0: i32, %arg1: i32, %arg2: i32) -> (i32, i32) {
    %c0_i32 = arith.constant 0 : i32
    return %arg2, %arg1 : i32, i32
  }
  func.func @transform_2(%arg0: i32, %arg1: i32, %arg2: i32) -> (i32, i32) {
    %c0_i32 = arith.constant 0 : i32
    %c0_i32_0 = arith.constant 0 : i32
    return %c0_i32, %arg1 : i32, i32
  }
  func.func @transform_3(%arg0: i32, %arg1: i32, %arg2: i32) -> (i32, i32) {
    %c0_i32 = arith.constant 0 : i32
    return %arg0, %arg1 : i32, i32
  }
  func.func @transform_4(%arg0: i32, %arg1: i32, %arg2: i32) -> (i32, i32) {
    %c0_i32 = arith.constant 0 : i32
    return %arg0, %arg1 : i32, i32
  }
}

</mosaic_0001>

<bundles_post_ra>
// kernel: tpu_custom_call.1
= control target key start
LH: loop header
LB: loop body
LE: loop exit
PB: predicated region body
PF: predicated region fallthrough
CT: control target
= control target key end

     0   :  { %9 = vsyncpa [#allocation4], 0  ;;  %s322_s0 = inlined_call_operand.hbm [shape: f32[16,128], index: 0, kind: input, shape index: {}]   ;;  %s323_s1 = inlined_call_operand.hbm [shape: f32[128,128], index: 1, kind: input, shape index: {}]   ;;  %s324_s2 = inlined_call_operand.vmem [shape: f32[1,128], index: 2, kind: input, shape index: {}]   ;;  %s325_s3 = inlined_call_operand.hbm [shape: f32[16,128], index: 3, kind: input, shape index: {}]   ;;  %s326_s4 = inlined_call_operand.hbm [shape: f32[16,128], index: 4, kind: output, shape index: {}]  }
   0x1   :  { %10 = vsyncpa [#allocation7], 0 }
   0x2   :  { %11 = vsyncpa [#allocation5], 0  ;;  %s29_s17 = sshll.u32 %s323_s1, 4  ;;  %s264_s18 = smov [#allocation6]   ;;  %s30_s17 = int_to_ptr.hbm [resolvable:$true] %s29_s17 }
   0x3   :  { %s31_s19 = sshll.u32 %s264_s18, 4  ;;  %s16_s22 = sshll.u32 %s322_s0, 4  ;;  %s32_s19 = int_to_ptr.vmem [resolvable:$true] %s31_s19  ;;  %s17_s22 = int_to_ptr.hbm [resolvable:$true] %s16_s22 }
   0x4   :  { %s265_s23 = smov 128   ;;  %s266_s24 = smov 8  }
   0x5   :  { %37 = dma.hbm_to_vmem [thread:$0]  %s30_s17, 2048, %s32_s19, [#allocation7], %s265_s23, %s265_s23, %s266_s24  }
   0x6   :  { %s267_s25 = smov [#allocation3]   ;;  %s44_s1 = sshll.u32 %s325_s3, 4  ;;  %s45_s1 = int_to_ptr.hbm [resolvable:$true] %s44_s1 }
   0x7   :  { %s18_s26 = sshll.u32 %s267_s25, 4  ;;  %s268_s0 = smov [#allocation8]   ;;  %s19_s26 = int_to_ptr.vmem [resolvable:$true] %s18_s26 }
   0x8   :  { %24 = dma.hbm_to_vmem [thread:$0]  %s17_s22, 256, %s19_s26, [#allocation4], %s265_s23, %s265_s23, %s266_s24  }
   0x9   :  { %s46_s29 = sshll.u32 %s268_s0, 4  ;;  %s47_s29 = int_to_ptr.vmem [resolvable:$true] %s46_s29 }
   0xa   :  { %52 = dma.hbm_to_vmem [thread:$0]  %s45_s1, 256, %s47_s29, [#allocation7], %s265_s23, %s265_s23, %s266_s24  }
   0xb   :  { %258 = dma.done.wait [#allocation4], 256  }
   0xc   :  { %259 = vsyncadd [#allocation4], 4294967040 }
   0xd   :  { %260 = dma.done.wait [#allocation7], 2304  }
   0xe   :  { %261 = vsyncadd [#allocation7], 4294964992  ;;  %v90_v0 = vld [vmem:[#allocation6 + $0x70] sm:$0xff]  ;;  %v91_v1 = vld [vmem:[#allocation6 + $0x78] sm:$0xff]  ;;  %s269_s5 = smov [#allocation9]   ;;  %s141_s9 = sshll.u32 %s326_s4, 4  ;;  %s142_s9 = int_to_ptr.hbm [resolvable:$true] %s141_s9 }
   0xf   :  { %v88_v2 = vld [vmem:[#allocation6 + $0x60] sm:$0xff]  ;;  %v99_v3 = vpack.c.bf16 %v91_v1, %v90_v0  ;;  %v89_v4 = vld [vmem:[#allocation6 + $0x68] sm:$0xff]  ;;  %v86_v6 = vld [vmem:[#allocation6 + $0x50] sm:$0xff]  ;;  %s139_s6 = sshll.u32 %s269_s5, 4  ;;  %s140_s6 = int_to_ptr.vmem [resolvable:$true] %s139_s6 }
  0x10   :  { %v98_v5 = vpack.c.bf16 %v89_v4, %v88_v2  ;;  %v87_v7 = vld [vmem:[#allocation6 + $0x58] sm:$0xff]  ;;  %v84_v9 = vld [vmem:[#allocation6 + $0x40] sm:$0xff]  ;;  %v85_v10 = vld [vmem:[#allocation6 + $0x48] sm:$0xff] }
  0x11   :  { %100 = vmatpush.bf16.msra.mxu0 %v99_v3  ;;  %v97_v8 = vpack.c.bf16 %v87_v7, %v86_v6  ;;  %v96_v11 = vpack.c.bf16 %v85_v10, %v84_v9  ;;  %v82_v12 = vld [vmem:[#allocation6 + $0x30] sm:$0xff]  ;;  %v83_v13 = vld [vmem:[#allocation6 + $0x38] sm:$0xff]  ;;  %v80_v15 = vld [vmem:[#allocation6 + $0x20] sm:$0xff] }
  0x12   :  { %v95_v14 = vpack.c.bf16 %v83_v13, %v82_v12  ;;  %v81_v16 = vld [vmem:[#allocation6 + $0x28] sm:$0xff]  ;;  %v78_v18 = vld [vmem:[#allocation6 + $0x10] sm:$0xff]  ;;  %v79_v19 = vld [vmem:[#allocation6 + $0x18] sm:$0xff] }
  0x13   :  { %v94_v17 = vpack.c.bf16 %v81_v16, %v80_v15  ;;  %v93_v20 = vpack.c.bf16 %v79_v19, %v78_v18  ;;  %v76_v21 = vld [vmem:[#allocation6] sm:$0xff]  ;;  %v77_v22 = vld [vmem:[#allocation6 + $0x8] sm:$0xff]  ;;  %v73_v24 = vld [vmem:[#allocation3] sm:$0xff] }
  0x14   :  { %v92_v23 = vpack.c.bf16 %v77_v22, %v76_v21  ;;  %v74_v25 = vld [vmem:[#allocation3 + $0x8] sm:$0xff]  ;;  %v161_v27 = vld [vmem:[%s324_s2] ss:$0 sm:$0xff]  ;;  %v129_v29 = vld [vmem:[#allocation8] sm:$0xff] }
  0x15   :  { %101 = vmatpush.bf16.msra.mxu0 %v98_v5  ;;  %v75_v26 = vpack.c.bf16 %v74_v25, %v73_v24  ;;  %v130_v33 = vld [vmem:[#allocation8 + $0x8] sm:$0xff] }
  0x19   :  { %102 = vmatpush.bf16.msra.mxu0 %v97_v8 }
  0x1d   :  { %103 = vmatpush.bf16.msra.mxu0 %v96_v11 }
  0x21   :  { %104 = vmatpush.bf16.msra.mxu0 %v95_v14 }
  0x25   :  { %105 = vmatpush.bf16.msra.mxu0 %v94_v17 }
  0x29   :  { %106 = vmatpush.bf16.msra.mxu0 %v93_v20 }
  0x2d   :  { %107 = vmatpush.bf16.msra.mxu0 %v92_v23 }
  0x30   :  { %108 = vmatmul.bf16.vlgmr.msra.gmra.mxu0 %v75_v26 }
  0xad   :  { %v109_v28 = vpop.f32.mrf.mxu0 }
  0xae   :  { %v127_v30 = vadd.f32 %v161_v27, %v109_v28 }
  0xb0   :  { %v131_v31 = vadd.f32 %v129_v29, %v127_v30 }
  0xb2   :  { %133 = vst [vmem:[#allocation9] sm:$0xff] %v131_v31 }
  0xb5   :  { %v111_v32 = vpop.f32.mrf.mxu0 }
  0xb6   :  { %v128_v34 = vadd.f32 %v161_v27, %v111_v32 }
  0xb8   :  { %v132_v35 = vadd.f32 %v130_v33, %v128_v34 }
  0xba   :  { %134 = vst [vmem:[#allocation9 + $0x8] sm:$0xff] %v132_v35 }
  0xbb   :  { %147 = dma.vmem_to_hbm [thread:$0]  %s140_s6, 256, %s142_s9, [#allocation5], %s265_s23, %s265_s23, %s266_s24  }
  0xbc   :  { %262 = dma.done.wait [#allocation5], 256  }
  0xbd   :  { %263 = vsyncadd [#allocation5], 4294967040 }
  0xbe   :  { %152 = vsyncpa [#allocation4], 1 }
  0xbf   :  { %153 = vsyncpa [#allocation7], 1 }
  0xc0   :  { %154 = vsyncpa [#allocation5], 1 }

</bundles_post_ra>
